<compile_context>
chip_gen: v6e
topology: v6e:2x2x1
jax: 0.10.0
libtpu: 0.0.40
codegen_flags: <defaults>
</compile_context>

<pallas_src>
import functools

import jax
import jax.numpy as jnp
from jax import lax
from jax.experimental import pallas as pl
from jax.experimental.pallas import tpu as pltpu


def _round_up(x, m):
    return ((x + m - 1) // m) * m


@functools.lru_cache(maxsize=1)
def _vmem_limit():
    """Scoped VMEM limit sized per TPU generation (v7x has only 64 MiB)."""
    try:
        info = pltpu.get_tpu_info()
        cap = int(getattr(info, "vmem_capacity_bytes", 128 * 1024 * 1024))
    except Exception:  # pragma: no cover - conservative fallback
        cap = 128 * 1024 * 1024
    return int(min(max(cap - 16 * 1024 * 1024, 32 * 1024 * 1024),
                   100 * 1024 * 1024))


# --------------------- 1x1 input_conv (all levels, one call) -----------------

def _make_pointwise_kernel(pack):
    def kernel(lvl_ref, x_ref, cb_ref, w_ref, o_ref):
        # lvl_ref: SMEM level table (used only by the weight index_map).
        del lvl_ref
        B, T, Cin = x_ref.shape
        Cout = w_ref.shape[2]
        # Batch folded into M: one (B*T, Cin) x (Cin, Cout) bf16 MXU matmul.
        acc = jnp.dot(x_ref[...].reshape(B * T, Cin), w_ref[0],
                      preferred_element_type=jnp.float32)
        # Precomputed coord-channel + bias table (f32), broadcast over batch.
        y = (acc.reshape(B, T, Cout) + cb_ref[...]).astype(o_ref.dtype)
        if pack:
            # Lane-dense store: pack rows [0,T/2) and [T/2,T) side by side so
            # the last dim is 2*Cout (>=128) -> unmasked vst.
            T2 = T // 2
            o_ref[...] = jnp.concatenate([y[:, :T2, :], y[:, T2:, :]], axis=-1)
        else:
            o_ref[...] = y
    return kernel


def pointwise_conv_multilevel(feats_nhwc, coords, params):
    """All levels of input_conv (1x1 conv + coord channels) in ONE pallas_call.

    feats_nhwc: list of (B, H_l, W_l, Cin) bf16
    coords:     list of (H_l*W_l, 2) f32  (x, y in [-1, 1])
    params:     list of (wf (Cin,Cout) bf16, wc (2,Cout) f32, b (Cout,) f32)
    returns:    list of (B, H_l, W_l, Cout) bf16
    """
    B, _, _, Cin = feats_nhwc[0].shape
    Cout = params[0][0].shape[1]
    dtype = feats_nhwc[0].dtype
    hws = [f.shape[1] * f.shape[2] for f in feats_nhwc]

    # Fixed lane/sublane-friendly row tile (multiple of 16); levels are padded
    # up to a multiple of T so every grid step is a full, aligned tile.
    T = min(512, _round_up(max(hws), 16))
    pack = (Cout % 128 != 0) and ((2 * Cout) % 128 == 0)

    x_parts, cb_parts, lvl_ids, padded = [], [], [], []
    for l, (f, c) in enumerate(zip(feats_nhwc, coords)):
        hw = hws[l]
        p_hw = _round_up(hw, T)
        padded.append(p_hw)
        x2 = f.reshape(B, hw, Cin)
        if p_hw > hw:
            x2 = jnp.pad(x2, ((0, 0), (0, p_hw - hw), (0, 0)))
        x_parts.append(x2)
        wf, wc, b = params[l]
        cb = coords[l].astype(jnp.float32) @ wc + b[None, :]      # (hw, Cout)
        if p_hw > hw:
            cb = jnp.pad(cb, ((0, p_hw - hw), (0, 0)))
        cb_parts.append(cb)
        lvl_ids += [l] * (p_hw // T)

    x_cat = jnp.concatenate(x_parts, axis=1)                       # (B, R, Cin)
    cb_cat = jnp.concatenate(cb_parts, axis=0)                     # (R, Cout)
    wf_all = jnp.stack([p[0] for p in params], axis=0)             # (L, Cin, Cout)
    lvl_arr = jnp.asarray(lvl_ids, dtype=jnp.int32)
    num_tiles = len(lvl_ids)
    R = x_cat.shape[1]

    if pack:
        out_shape = jax.ShapeDtypeStruct((B, R // 2, 2 * Cout), dtype)
        out_spec = pl.BlockSpec((B, T // 2, 2 * Cout), lambda t, lvl: (0, t, 0))
    else:
        out_shape = jax.ShapeDtypeStruct((B, R, Cout), dtype)
        out_spec = pl.BlockSpec((B, T, Cout), lambda t, lvl: (0, t, 0))

    out = pl.pallas_call(
        _make_pointwise_kernel(pack),
        out_shape=out_shape,
        grid_spec=pltpu.PrefetchScalarGridSpec(
            num_scalar_prefetch=1,
            grid=(num_tiles,),
            in_specs=[
                pl.BlockSpec((B, T, Cin), lambda t, lvl: (0, t, 0)),
                pl.BlockSpec((T, Cout), lambda t, lvl: (t, 0)),
                # Level table (prefetched to SMEM) picks this tile's weights.
                pl.BlockSpec((1, Cin, Cout), lambda t, lvl: (lvl[t], 0, 0)),
            ],
            out_specs=out_spec,
        ),
        compiler_params=pltpu.CompilerParams(
            dimension_semantics=("parallel",),
            vmem_limit_bytes=_vmem_limit()),
    )(lvl_arr, x_cat, cb_cat, wf_all)

    # Un-pack lane-dense rows (cheap XLA slice+concat, fuses into the copies
    # the surrounding glue already performs), then split levels.
    if pack:
        p = out.reshape(B, num_tiles, T // 2, 2 * Cout)
        u = jnp.concatenate([p[..., :Cout], p[..., Cout:]], axis=2)
        u = u.reshape(B, R, Cout)
    else:
        u = out

    res, off = [], 0
    for l, f in enumerate(feats_nhwc):
        H, W = f.shape[1], f.shape[2]
        res.append(u[:, off:off + H * W, :].reshape(B, H, W, Cout))
        off += padded[l]
    return res


# ------------------- fuse ConvModule: 3x3 conv + GN + ReLU -------------------

def _make_conv3x3_gn_relu_kernel(B, H, W, C, G, eps, pack):
    Cg = C // G
    HW = H * W
    BHW = B * HW
    HW2 = HW // 2

    def kernel(x_ref, w_ref, gamma_ref, beta_ref, o_ref, xp_ref):
        # x_ref: (B, H, W, C) bf16 ; w_ref: (9C, C) bf16 (taps ordered dy, dx)
        # gamma/beta: (1, C) f32 ; xp_ref: (B, H+2, W+2, C) bf16 scratch.
        # In-kernel zero border (bf16: half the store traffic of a f32 scratch)
        # + interior copy: replaces any wrapper-side jnp.pad HBM round trip.
        xp_ref[:, 0:1, :, :] = jnp.zeros((B, 1, W + 2, C), xp_ref.dtype)
        xp_ref[:, H + 1:H + 2, :, :] = jnp.zeros((B, 1, W + 2, C), xp_ref.dtype)
        xp_ref[:, :, 0:1, :] = jnp.zeros((B, H + 2, 1, C), xp_ref.dtype)
        xp_ref[:, :, W + 1:W + 2, :] = jnp.zeros((B, H + 2, 1, C), xp_ref.dtype)
        xp_ref[:, 1:H + 1, 1:W + 1, :] = x_ref[...]

        # 3x3 conv as nine accumulating K=C bf16 MXU matmuls over shifted
        # windows of the padded scratch — no materialized (HW, 9C) im2col slab.
        acc = None
        for k in range(9):
            dy, dx = k // 3, k % 3
            piece = xp_ref[:, dy:dy + H, dx:dx + W, :].reshape(BHW, C)
            part = jnp.dot(piece, w_ref[k * C:(k + 1) * C, :],
                           preferred_element_type=jnp.float32)
            acc = part if acc is None else acc + part

        # GroupNorm: per-image stats over spatial x channels-within-group (f32).
        accB = acc.reshape(B, HW, C)
        n = float(HW * Cg)
        s_c = jnp.sum(accB, axis=1)                                # (B, C)
        sq_c = jnp.sum(accB * accB, axis=1)                        # (B, C)
        if G == C:
            # Fast path (one group per channel): no one_hot matmuls needed.
            mean_c = s_c / n
            var_c = jnp.maximum(sq_c / n - mean_c * mean_c, 0.0)
            inv_c = lax.rsqrt(var_c + eps)
        else:
            one_hot = (lax.broadcasted_iota(jnp.int32, (C, G), 0) // Cg
                       == lax.broadcasted_iota(jnp.int32, (C, G), 1)
                       ).astype(jnp.float32)
            mean_g = jnp.dot(s_c, one_hot, preferred_element_type=jnp.float32) / n
            ex2_g = jnp.dot(sq_c, one_hot, preferred_element_type=jnp.float32) / n
            var_g = jnp.maximum(ex2_g - mean_g * mean_g, 0.0)
            inv_g = lax.rsqrt(var_g + eps)
            mean_c = jnp.dot(mean_g, one_hot.T, preferred_element_type=jnp.float32)
            inv_c = jnp.dot(inv_g, one_hot.T, preferred_element_type=jnp.float32)

        y = (accB - mean_c[:, None, :]) * (inv_c[:, None, :] * gamma_ref[...]) \
            + beta_ref[...]
        y = jnp.maximum(y, 0.0).astype(o_ref.dtype)    # ReLU (ConvModule default)
        if pack:
            # Lane-dense store: rows [0,HW/2) and [HW/2,HW) packed side by side
            # -> last dim 2C (>=128), unmasked vst (wrapper un-packs).
            o_ref[...] = jnp.concatenate([y[:, :HW2, :], y[:, HW2:, :]], axis=-1)
        else:
            o_ref[...] = y

    return kernel


def conv3x3_gn_relu(x_nhwc, w9, gamma, beta, num_groups, eps=1e-5):
    """ConvModule: 3x3 conv (pad=1, no bias) -> GroupNorm -> ReLU, one kernel.

    Whole batch is processed in a single grid step (one (B*HW, C) matmul per
    tap) — at these feature-map sizes the workload is step/launch-overhead
    bound, so fewer/larger steps win.
    """
    B, H, W, C = x_nhwc.shape
    HW = H * W
    pack = (C % 128 != 0) and ((2 * C) % 128 == 0) and (HW % 2 == 0)
    kernel = _make_conv3x3_gn_relu_kernel(B, H, W, C, num_groups, eps, pack)

    if pack:
        out_shape = jax.ShapeDtypeStruct((B, HW // 2, 2 * C), x_nhwc.dtype)
        out_spec = pl.BlockSpec((B, HW // 2, 2 * C), lambda i: (0, 0, 0))
    else:
        out_shape = jax.ShapeDtypeStruct((B, HW, C), x_nhwc.dtype)
        out_spec = pl.BlockSpec((B, HW, C), lambda i: (0, 0, 0))

    out = pl.pallas_call(
        kernel,
        out_shape=out_shape,
        grid=(1,),
        in_specs=[
            pl.BlockSpec((B, H, W, C), lambda i: (0, 0, 0, 0)),
            pl.BlockSpec((9 * C, C), lambda i: (0, 0)),
            pl.BlockSpec((1, C), lambda i: (0, 0)),
            pl.BlockSpec((1, C), lambda i: (0, 0)),
        ],
        out_specs=out_spec,
        scratch_shapes=[pltpu.VMEM((B, H + 2, W + 2, C), jnp.bfloat16)],
        compiler_params=pltpu.CompilerParams(
            dimension_semantics=("arbitrary",),
            vmem_limit_bytes=_vmem_limit()),
    )(x_nhwc, w9, gamma.reshape(1, C), beta.reshape(1, C))

    if pack:
        out = jnp.concatenate([out[..., :C], out[..., C:]], axis=1)
    return out.reshape(B, H, W, C)


# ----------------------- pure-JAX references (checking) ----------------------

def pointwise_conv_ref(x_nhwc, coord, wf, wc, bias):
    B, H, W, Cin = x_nhwc.shape
    Cout = wf.shape[1]
    y = jnp.einsum('bhwc,cd->bhwd', x_nhwc.astype(jnp.float32),
                   wf.astype(jnp.float32))
    cc = (coord.astype(jnp.float32) @ wc + bias[None, :]).reshape(H, W, Cout)
    return (y + cc[None]).astype(x_nhwc.dtype)


def conv3x3_gn_relu_ref(x_nhwc, w9, gamma, beta, num_groups, eps=1e-5):
    B, H, W, C = x_nhwc.shape
    w = w9.reshape(3, 3, C, C)
    y = lax.conv_general_dilated(x_nhwc, w, (1, 1), ((1, 1), (1, 1)),
                                 dimension_numbers=('NHWC', 'HWIO', 'NHWC'),
                                 preferred_element_type=jnp.float32)
    G, Cg = num_groups, C // num_groups
    yg = y.reshape(B, H, W, G, Cg)
    mean = jnp.mean(yg, axis=(1, 2, 4), keepdims=True)
    var = jnp.mean((yg - mean) ** 2, axis=(1, 2, 4), keepdims=True)
    yn = ((yg - mean) * lax.rsqrt(var + eps)).reshape(B, H, W, C)
    return jnp.maximum(yn * gamma + beta, 0.0).astype(x_nhwc.dtype)


# ------------------------------- glue (JAX) ----------------------------------

# TODO(synk): bilinear (align_corners=True) cross-level resize is a
# data-dependent gather/lerp; it stays in plain JAX glue, not a Pallas kernel.
def bilinear_resize_align_corners(x, out_h, out_w):
    """Matches F.interpolate(mode='bilinear', align_corners=True). x: [B,H,W,C]."""
    B, H, W, C = x.shape
    if H == out_h and W == out_w:
        return x
    xf = x.astype(jnp.float32)

    def src_coords(out_n, in_n):
        if out_n == 1:
            return jnp.zeros((1,), jnp.float32)
        return jnp.arange(out_n, dtype=jnp.float32) * ((in_n - 1) / (out_n - 1))

    ys, xs = src_coords(out_h, H), src_coords(out_w, W)
    y0 = jnp.floor(ys).astype(jnp.int32)
    x0 = jnp.floor(xs).astype(jnp.int32)
    y1 = jnp.minimum(y0 + 1, H - 1)
    x1 = jnp.minimum(x0 + 1, W - 1)
    wy = (ys - y0.astype(jnp.float32))[None, :, None, None]
    wx = (xs - x0.astype(jnp.float32))[None, None, :, None]
    a = xf[:, y0][:, :, x0]
    b = xf[:, y0][:, :, x1]
    c = xf[:, y1][:, :, x0]
    d = xf[:, y1][:, :, x1]
    out = a * (1 - wy) * (1 - wx) + b * (1 - wy) * wx + c * wy * (1 - wx) + d * wy * wx
    return out.astype(x.dtype)


class MLVLFuseModulePallas:
    def __init__(self, input_dims, embed_dims, num_levels, num_fuse, num_groups, key,
                 dtype=jnp.bfloat16):
        self.input_dims = input_dims
        self.embed_dims = embed_dims
        self.num_levels = num_levels
        self.num_fuse = num_fuse
        self.num_groups = num_groups
        self.dtype = dtype
        self.shuffle_channles = embed_dims // 4
        self.remain_chs = embed_dims - 2 * self.shuffle_channles
        self.fuse_lvl_list = [(l, min(l + 1, num_levels - 1), max(l - 1, 0))
                              for l in range(num_levels)]

        keys = jax.random.split(key, num_levels + num_fuse)
        # input_conv[lvl]: Conv2d(input_dims+2, embed_dims, 1)  (normal_init std=0.01, bias=0)
        self.input_conv = []
        for l in range(num_levels):
            wfull = 0.01 * jax.random.normal(keys[l], (input_dims + 2, embed_dims),
                                             jnp.float32)
            wf = wfull[:input_dims].astype(dtype)            # feature-channel weights
            wc = wfull[input_dims:input_dims + 2]            # coord-channel weights (f32)
            b = jnp.zeros((embed_dims,), jnp.float32)
            self.input_conv.append((wf, wc, b))
        # fuse_convs[i]: Conv2d(embed_dims, embed_dims, 3, pad=1, bias=False) + GN + ReLU
        self.fuse_convs = []
        for i in range(num_fuse):
            w_hwio = 0.01 * jax.random.normal(keys[num_levels + i],
                                              (3, 3, embed_dims, embed_dims),
                                              jnp.float32)
            w9 = w_hwio.reshape(9 * embed_dims, embed_dims).astype(dtype)  # tap-major slab
            gamma = jnp.ones((embed_dims,), jnp.float32)
            beta = jnp.zeros((embed_dims,), jnp.float32)
            self.fuse_convs.append((w9, gamma, beta))

    def _coord(self, H, W):
        # Matches torch: x over width, y over height, concat order [x, y].
        xs = jnp.linspace(-1.0, 1.0, W, dtype=jnp.float32)
        ys = jnp.linspace(-1.0, 1.0, H, dtype=jnp.float32)
        xx = jnp.broadcast_to(xs[None, :], (H, W))
        yy = jnp.broadcast_to(ys[:, None], (H, W))
        return jnp.stack([xx, yy], axis=-1).reshape(H * W, 2)   # (HW, 2) f32

    def _single_shuffle(self, feats, w9, gamma, beta, fuse_fn):
        rc, sc = self.remain_chs, self.shuffle_channles
        fused = []
        for tar, top, down in self.fuse_lvl_list:
            tar_f, top_f, down_f = feats[tar], feats[top], feats[down]
            H, W = tar_f.shape[1], tar_f.shape[2]
            remain = tar_f[..., :rc]
            from_top = bilinear_resize_align_corners(top_f[..., rc + sc:], H, W)
            from_down = bilinear_resize_align_corners(down_f[..., rc:rc + sc], H, W)
            fused.append(jnp.concatenate([remain, from_top, from_down], axis=-1))
        return [fuse_fn(f, w9, gamma, beta, self.num_groups) for f in fused]

    def forward(self, inputs, use_pallas=True):
        """inputs: list of NCHW arrays [B, input_dims, H_l, W_l]; returns NCHW list."""
        feats_nhwc = [jnp.transpose(x, (0, 2, 3, 1)).astype(self.dtype)
                      for x in inputs]
        coords = [self._coord(f.shape[1], f.shape[2]) for f in feats_nhwc]

        if use_pallas:
            feats = pointwise_conv_multilevel(feats_nhwc, coords, self.input_conv)
        else:
            feats = [pointwise_conv_ref(f, c, *p)
                     for f, c, p in zip(feats_nhwc, coords, self.input_conv)]

        fuse = conv3x3_gn_relu if use_pallas else conv3x3_gn_relu_ref
        for (w9, gamma, beta) in self.fuse_convs:
            feats = self._single_shuffle(feats, w9, gamma, beta, fuse)

        return [jnp.transpose(f, (0, 3, 1, 2)).astype(jnp.float32) for f in feats]


# ----------------------------------- main ------------------------------------

if __name__ == "__main__":
    key = jax.random.PRNGKey(0)
    B, input_dims, embed_dims = 2, 16, 64
    num_levels, num_fuse, num_groups = 3, 2, 64
    spatial = [(16, 16), (8, 8), (4, 4)]

    kparam, *kin = jax.random.split(key, 1 + num_levels)
    module = MLVLFuseModulePallas(input_dims, embed_dims, num_levels,
                                  num_fuse, num_groups, kparam)

    inputs = [jax.random.normal(kin[l], (B, input_dims, h, w), jnp.float32)
              for l, (h, w) in enumerate(spatial)]

    outs = module.forward(inputs, use_pallas=True)
    outs = [jax.block_until_ready(o) for o in outs]

    refs = module.forward(inputs, use_pallas=False)
    for o, r in zip(outs, refs):
        assert o.shape == r.shape, (o.shape, r.shape)
        assert bool(jnp.all(jnp.isfinite(o)))
        max_diff = float(jnp.max(jnp.abs(o - r)))
        # bf16 activations/weights (f32 accumulation) -> slightly looser tolerance.
        assert max_diff < 3e-2, f"mismatch vs reference: {max_diff}"

    print("KERNEL_OK")
</pallas_src>

<mosaic_0001>
module attributes {stable_mosaic.version = 11 : i64} {
  func.func @kernel(%arg0: i32, %arg1: memref<3xi32, #tpu.memory_space<smem>>, %arg2: memref<2x256x16xbf16, #tpu.memory_space<vmem>>, %arg3: memref<256x64xf32, #tpu.memory_space<vmem>>, %arg4: memref<1x16x64xbf16, #tpu.memory_space<vmem>>, %arg5: memref<2x128x128xbf16, #tpu.memory_space<vmem>>) attributes {dimension_semantics = [#tpu.dimension_semantics<parallel>], iteration_bounds = array<i64: 3>, scalar_prefetch = 1 : i64, scratch_operands = 0 : i64, tpu.core_type = #tpu.core_type<tc>, window_params = [{transform_indices = @transform_0, window_bounds = array<i64: 2, 256, 16>}, {transform_indices = @transform_1, window_bounds = array<i64: 256, 64>}, {transform_indices = @transform_2, window_bounds = array<i64: 1, 16, 64>}, {transform_indices = @transform_3, window_bounds = array<i64: 2, 128, 128>}]} {
    %c0 = arith.constant 0 : index
    %c0_0 = arith.constant 0 : index
    %c0_1 = arith.constant 0 : index
    %0 = vector.load %arg2[%c0, %c0_0, %c0_1] : memref<2x256x16xbf16, #tpu.memory_space<vmem>>, vector<2x256x16xbf16>
    %1 = vector.shape_cast %0 : vector<2x256x16xbf16> to vector<512x16xbf16>
    %c0_2 = arith.constant 0 : index
    %c0_3 = arith.constant 0 : index
    %c0_4 = arith.constant 0 : index
    %2 = vector.load %arg4[%c0_2, %c0_3, %c0_4] : memref<1x16x64xbf16, #tpu.memory_space<vmem>>, vector<1x16x64xbf16>
    %3 = vector.shape_cast %2 : vector<1x16x64xbf16> to vector<16x64xbf16>
    %cst = arith.constant dense<0.000000e+00> : vector<512x64xf32>
    %4 = tpu.matmul %1, %3, %cst {dimension_numbers = #tpu.dot_dimension_numbers<[1], [0], [0], [1], [0, 0, 1, 1], [], []>} : vector<512x16xbf16>, vector<16x64xbf16>, vector<512x64xf32> -> vector<512x64xf32>
    %5 = vector.shape_cast %4 : vector<512x64xf32> to vector<2x256x64xf32>
    %c0_5 = arith.constant 0 : index
    %c0_6 = arith.constant 0 : index
    %6 = vector.load %arg3[%c0_5, %c0_6] : memref<256x64xf32, #tpu.memory_space<vmem>>, vector<256x64xf32>
    %7 = vector.shape_cast %6 : vector<256x64xf32> to vector<1x256x64xf32>
    %8 = vector.broadcast %7 : vector<1x256x64xf32> to vector<2x256x64xf32>
    %9 = arith.addf %5, %8 : vector<2x256x64xf32>
    %10 = arith.truncf %9 : vector<2x256x64xf32> to vector<2x256x64xbf16>
    %11 = vector.extract_strided_slice %10 {offsets = [0, 0, 0], sizes = [2, 128, 64], strides = [1, 1, 1]} : vector<2x256x64xbf16> to vector<2x128x64xbf16>
    %12 = vector.extract_strided_slice %10 {offsets = [0, 128, 0], sizes = [2, 128, 64], strides = [1, 1, 1]} : vector<2x256x64xbf16> to vector<2x128x64xbf16>
    %13 = tpu.concatenate %11, %12 in 2 : vector<2x128x64xbf16>, vector<2x128x64xbf16> -> vector<2x128x128xbf16>
    %c0_7 = arith.constant 0 : index
    %c0_8 = arith.constant 0 : index
    %c0_9 = arith.constant 0 : index
    %14 = vector.load %arg5[%c0_7, %c0_8, %c0_9] : memref<2x128x128xbf16, #tpu.memory_space<vmem>>, vector<2x128x128xbf16>
    tpu.vector_store %arg5[%c0_7, %c0_8, %c0_9], %13 {strides = array<i32>} : memref<2x128x128xbf16, #tpu.memory_space<vmem>>, vector<2x128x128xbf16>,
    return
  }
  func.func @transform_0(%arg0: i32, %arg1: memref<3xi32, #tpu.memory_space<smem>>) -> (i32, i32, i32) {
    %c0_i32 = arith.constant 0 : i32
    %c0_i32_0 = arith.constant 0 : i32
    %c0_i32_1 = arith.constant 0 : i32
    return %c0_i32, %arg0, %c0_i32_0 : i32, i32, i32
  }
  func.func @transform_1(%arg0: i32, %arg1: memref<3xi32, #tpu.memory_space<smem>>) -> (i32, i32) {
    %c0_i32 = arith.constant 0 : i32
    %c0_i32_0 = arith.constant 0 : i32
    return %arg0, %c0_i32 : i32, i32
  }
  func.func @transform_2(%arg0: i32, %arg1: memref<3xi32, #tpu.memory_space<smem>>) -> (i32, i32, i32) {
    %0 = arith.index_cast %arg0 : i32 to index
    %1 = memref.load %arg1[%0] : memref<3xi32, #tpu.memory_space<smem>>
    %c0_i32 = arith.constant 0 : i32
    %c0_i32_0 = arith.constant 0 : i32
    %c0_i32_1 = arith.constant 0 : i32
    return %1, %c0_i32, %c0_i32_0 : i32, i32, i32
  }
  func.func @transform_3(%arg0: i32, %arg1: memref<3xi32, #tpu.memory_space<smem>>) -> (i32, i32, i32) {
    %c0_i32 = arith.constant 0 : i32
    %c0_i32_0 = arith.constant 0 : i32
    %c0_i32_1 = arith.constant 0 : i32
    return %c0_i32, %arg0, %c0_i32_0 : i32, i32, i32
  }
}

</mosaic_0001>

<bundles_post_ra>
// kernel: tpu_custom_call.1
= control target key start
LH: loop header
LB: loop body
LE: loop exit
PB: predicated region body
PF: predicated region fallthrough
CT: control target
= control target key end

     0   :  { %s2516_s0 = inlined_call_operand.vmem [shape: s32[3], index: 0, kind: input, shape index: {}]   ;;  %s2517_s1 = inlined_call_operand.vmem [shape: bf16[2,768,16], index: 1, kind: input, shape index: {}]   ;;  %s2518_s2 = inlined_call_operand.vmem [shape: f32[768,64], index: 2, kind: input, shape index: {}]   ;;  %s2519_s3 = inlined_call_operand.vmem [shape: bf16[3,16,64], index: 3, kind: input, shape index: {}]   ;;  %s2520_s4 = inlined_call_operand.hbm [shape: bf16[2,384,128], index: 4, kind: output, shape index: {}]  }
   0x1   :  { %s9_s17 = sshll.u32 %s2516_s0, 4  ;;  %s10_s17 = int_to_ptr.vmem [resolvable:$true] %s9_s17 }
   0x2   :  { %s1946_s18 = scalar_lea.vmem %s10_s17, 16  ;;  %p1951_p1 = scmp.lt.s32.totalorder %s10_s17, %s10_s17 }
   0x3   :  { %p1947_p0 = scmp.ne.s32.totalorder %s10_s17, %s1946_s18  ;;  %p1952_p2 = scmp.lt.s32.totalorder %s1946_s18, %s1946_s18 }
   0x5   :  { %p1953_p3 = por %p1952_p2, %p1951_p1 }
   0x7   :  { %p1954_p4 = pnand %p1953_p3, %p1947_p0 }
   0x9   :  { %1957 = shalt.err (!%p1954_p4)  }
   0xa   :  { %s1996_s19 = smov [#allocation3]  }
   0xb   :  { %12 = dma.vmem_to_smem %s10_s17, 16, %s1996_s19, [#allocation2] }
   0xc   :  { %1974 = dma.done.wait [#allocation2], 16 }
   0xd   :  { %1975 = vsyncadd [#allocation2], 4294967280 }
   0xe   :  { %14 = sfence }
   0xf   :  { %15 = vsyncpa [#allocation6], 0 }
  0x10   :  { %17 = vsyncpa [#allocation6 + $0x1], 0  ;;  %s2033_s20 = smov 0   ;;  %s2035_s21 = smov 0  }
  0x11   :  { %s2037_s0 = smov 0   ;;  %s2039_s22 = smov 0  }
  0x12 LB: > { %s2054_s23 = sadd.s32 4294967295, %s1994_s22   ;;  %s1640_s24 = sadd.s32 4294967294, %s1994_s22   ;;  %s1994_s22 = sphi %s2039_s22, %s2540_s22   ;;  %s1990_s0 = sphi %s2037_s0, %s2539_s0   ;;  %s1986_s21 = sphi %s2035_s21, %s2538_s21   ;;  %s1982_s20 = sphi %s2033_s20, %s2537_s20  }
  0x13   : > { %s2058_s25 = sadd.s32 1, %s1994_s22   ;;  %s30_s26 = sadd.s32 1, %s1990_s0 }
  0x14   : > { %s27_s27 = ssub.s32 %s1994_s22, %s2058_s25  ;;  %p37_p5 = scmp.ne.s32.totalorder %s1990_s0, %s1986_s21 }
  0x15   : > { %p28_p6 = scmp.eq.s32.totalorder %s27_s27, 0  ;;  %p38_p7 = scmp.eq.s32.totalorder %s1994_s22, 0 }
  0x16   : > { %p121_p8 = scmp.eq.s32.totalorder %s2054_s23, 2  ;;  %p126_p9 = scmp.ne.s32.totalorder %s1986_s21, %s1982_s20 }
  0x17   : > { %s2070_s28 = scalar_select %p28_p6, %s1990_s0, %s30_s26  }
  0x18   : > { %p39_p10 = por %p38_p7, %p37_p5  ;;  %p2072_p11 = por %p121_p8, %p37_p5 }
  0x19   : > { %p127_p12 = scmp.eq.s32.totalorder %s1640_s24, 2  ;;  %p1642_p0 = scmp.ge.s32.totalorder %s1994_s22, 3 }
  0x1b   : > { %p2076_p13 = por %p127_p12, %p126_p9  ;;  %143 = sbr.rel (%p1642_p0) target bundleno = 52 (0x34), region = 16 }
  0x20   : > { %146 = sbr.rel (!%p39_p10) target bundleno = 52 (0x34), region = 20  ;;  %s148_s5 = sand.u32 (%p39_p10), 1, %s1990_s0  }
  0x21   : > { %s1755_s6 = sshll.u32 (%p39_p10), %s1994_s22, 7  ;;  %s1643_s7 = sshll.u32 (%p39_p10), %s148_s5, 8 }
  0x22   : > { %s2086_s10 = scalar_lea.vmem (%p39_p10), %s2517_s1, %s1755_s6  ;;  %s2091_s11 = scalar_lea.vmem (%p39_p10), [#allocation4], %s1643_s7 }
  0x23   : > { %v170_v0 = vld [vmem:[%s2086_s10] sm:$0xff] (%p39_p10)   ;;  %v174_v1 = vld [vmem:[%s2086_s10 + $0x8] sm:$0xff] (%p39_p10)   ;;  %v178_v2 = vld [vmem:[%s2086_s10 + $0x10] sm:$0xff] (%p39_p10)  }
  0x24   : > { %171 = vst [vmem:[%s2091_s11] sm:$0xff] (%p39_p10), %v170_v0   ;;  %175 = vst [vmem:[%s2091_s11 + $0x8] sm:$0xff] (%p39_p10), %v174_v1   ;;  %v182_v3 = vld [vmem:[%s2086_s10 + $0x18] sm:$0xff] (%p39_p10)   ;;  %v186_v4 = vld [vmem:[%s2086_s10 + $0x20] sm:$0xff] (%p39_p10)  }
  0x25   : > { %179 = vst [vmem:[%s2091_s11 + $0x10] sm:$0xff] %v178_v2   ;;  %v190_v5 = vld [vmem:[%s2086_s10 + $0x28] sm:$0xff]   ;;  %183 = vst [vmem:[%s2091_s11 + $0x18] sm:$0xff] %v182_v3   ;;  %v194_v6 = vld [vmem:[%s2086_s10 + $0x30] sm:$0xff]  }
  0x26   : > { %187 = vst [vmem:[%s2091_s11 + $0x20] sm:$0xff] %v186_v4   ;;  %191 = vst [vmem:[%s2091_s11 + $0x28] sm:$0xff] %v190_v5   ;;  %v198_v7 = vld [vmem:[%s2086_s10 + $0x38] sm:$0xff]   ;;  %v202_v8 = vld [vmem:[%s2086_s10 + $0x40] sm:$0xff]  }
  0x27   : > { %195 = vst [vmem:[%s2091_s11 + $0x30] sm:$0xff] %v194_v6   ;;  %199 = vst [vmem:[%s2091_s11 + $0x38] sm:$0xff] %v198_v7   ;;  %v206_v9 = vld [vmem:[%s2086_s10 + $0x48] sm:$0xff]   ;;  %v210_v10 = vld [vmem:[%s2086_s10 + $0x50] sm:$0xff]  }
  0x28   : > { %203 = vst [vmem:[%s2091_s11 + $0x40] sm:$0xff] %v202_v8   ;;  %v214_v11 = vld [vmem:[%s2086_s10 + $0x58] sm:$0xff]   ;;  %207 = vst [vmem:[%s2091_s11 + $0x48] sm:$0xff] %v206_v9   ;;  %v218_v12 = vld [vmem:[%s2086_s10 + $0x60] sm:$0xff]  }
  0x29   : > { %211 = vst [vmem:[%s2091_s11 + $0x50] sm:$0xff] %v210_v10   ;;  %215 = vst [vmem:[%s2091_s11 + $0x58] sm:$0xff] %v214_v11   ;;  %v222_v13 = vld [vmem:[%s2086_s10 + $0x68] sm:$0xff]   ;;  %v226_v14 = vld [vmem:[%s2086_s10 + $0x70] sm:$0xff]  }
  0x2a   : > { %219 = vst [vmem:[%s2091_s11 + $0x60] sm:$0xff] %v218_v12   ;;  %223 = vst [vmem:[%s2091_s11 + $0x68] sm:$0xff] %v222_v13   ;;  %v230_v15 = vld [vmem:[%s2086_s10 + $0x78] sm:$0xff]   ;;  %v234_v16 = vld [vmem:[%s2086_s10 + $0x180] sm:$0xff]  }
  0x2b   : > { %227 = vst [vmem:[%s2091_s11 + $0x70] sm:$0xff] %v226_v14   ;;  %v238_v17 = vld [vmem:[%s2086_s10 + $0x188] sm:$0xff]   ;;  %231 = vst [vmem:[%s2091_s11 + $0x78] sm:$0xff] %v230_v15   ;;  %v242_v18 = vld [vmem:[%s2086_s10 + $0x190] sm:$0xff]  }
  0x2c   : > { %235 = vst [vmem:[%s2091_s11 + $0x80] sm:$0xff] %v234_v16   ;;  %239 = vst [vmem:[%s2091_s11 + $0x88] sm:$0xff] %v238_v17   ;;  %v246_v19 = vld [vmem:[%s2086_s10 + $0x198] sm:$0xff]   ;;  %v250_v20 = vld [vmem:[%s2086_s10 + $0x1a0] sm:$0xff]  }
  0x2d   : > { %243 = vst [vmem:[%s2091_s11 + $0x90] sm:$0xff] %v242_v18   ;;  %247 = vst [vmem:[%s2091_s11 + $0x98] sm:$0xff] %v246_v19   ;;  %v254_v21 = vld [vmem:[%s2086_s10 + $0x1a8] sm:$0xff]   ;;  %v258_v22 = vld [vmem:[%s2086_s10 + $0x1b0] sm:$0xff]  }
  0x2e   : > { %251 = vst [vmem:[%s2091_s11 + $0xa0] sm:$0xff] %v250_v20   ;;  %v262_v23 = vld [vmem:[%s2086_s10 + $0x1b8] sm:$0xff]   ;;  %255 = vst [vmem:[%s2091_s11 + $0xa8] sm:$0xff] %v254_v21   ;;  %v266_v24 = vld [vmem:[%s2086_s10 + $0x1c0] sm:$0xff]  }
  0x2f   : > { %259 = vst [vmem:[%s2091_s11 + $0xb0] sm:$0xff] %v258_v22   ;;  %263 = vst [vmem:[%s2091_s11 + $0xb8] sm:$0xff] %v262_v23   ;;  %v270_v25 = vld [vmem:[%s2086_s10 + $0x1c8] sm:$0xff]   ;;  %v274_v26 = vld [vmem:[%s2086_s10 + $0x1d0] sm:$0xff]  }
  0x30   : > { %267 = vst [vmem:[%s2091_s11 + $0xc0] sm:$0xff] %v266_v24   ;;  %271 = vst [vmem:[%s2091_s11 + $0xc8] sm:$0xff] %v270_v25   ;;  %v278_v27 = vld [vmem:[%s2086_s10 + $0x1d8] sm:$0xff]   ;;  %v282_v28 = vld [vmem:[%s2086_s10 + $0x1e0] sm:$0xff]  }
  0x31   : > { %275 = vst [vmem:[%s2091_s11 + $0xd0] sm:$0xff] %v274_v26   ;;  %v286_v29 = vld [vmem:[%s2086_s10 + $0x1e8] sm:$0xff]   ;;  %279 = vst [vmem:[%s2091_s11 + $0xd8] sm:$0xff] %v278_v27   ;;  %v290_v30 = vld [vmem:[%s2086_s10 + $0x1f0] sm:$0xff]  }
  0x32   : > { %283 = vst [vmem:[%s2091_s11 + $0xe0] sm:$0xff] %v282_v28   ;;  %287 = vst [vmem:[%s2091_s11 + $0xe8] sm:$0xff] %v286_v29   ;;  %v294_v31 = vld [vmem:[%s2086_s10 + $0x1f8] sm:$0xff]  }
  0x33   : > { %291 = vst [vmem:[%s2091_s11 + $0xf0] sm:$0xff] %v290_v30   ;;  %295 = vst [vmem:[%s2091_s11 + $0xf8] sm:$0xff] %v294_v31  }
  0x34 PF: > { %p1646_p1 = scmp.ge.s32.totalorder %s1994_s22, 1  ;;  %p467_p2 = scmp.lt.s32.totalorder %s1994_s22, 4 }
  0x36   : > { %p468_p3 = pnand %p1646_p1, %p467_p2 }
  0x37   : > { %s515_s12 = sld [smem:[#allocation3 + %s2054_s23]] (!%p468_p3)  ;;  %s2158_s13 = sand.u32 (!%p468_p3), 1, %s1986_s21  }
  0x38   : > { %471 = sbr.rel (%p468_p3) target bundleno = 464 (0x1d0), region = 69  ;;  %s1647_s14 = sshll.u32 (!%p468_p3), %s2158_s13, 8 }
  0x39   : > { %s2161_s15 = scalar_lea.vmem (!%p468_p3), [#allocation4], %s1647_s14  ;;  %s1649_s24 = sshll.u32 (!%p468_p3), %s2054_s23, 5 }
  0x3a   : > { %p510_p5 = scmp.lt.s32.totalorder (!%p468_p3), %s1649_s24, 95  ;;  %s1997_s7 = smov (!%p468_p3), 64  }
  0x3b   : > { %s1648_s8 = sshll.u32 (!%p468_p3), %s2158_s13, 7  ;;  %s1512_s10 = scalar_lea.sflag (!%p468_p3), [#allocation6], %s2158_s13 }
  0x3c   : > { %s2389_s9 = scalar_lea.vmem (!%p468_p3), [#allocation5], %s1648_s8 }
  0x3d   : > { %vm756_vm0 = vcmask 130048   ;;  %v1914_v32 = vld [vmem:[%s2161_s15] sm:$0xff]   ;;  %p516_p4 = scmp.lt.s32.totalorder %s515_s12, 2  ;;  %v1916_v35 = vld [vmem:[%s2161_s15 + $0x8] sm:$0xff]   ;;  %v1918_v37 = vld [vmem:[%s2161_s15 + $0x10] sm:$0xff]   ;;  %s2544_s24 = smov (!%p510_p5, %s1649_s24), 95 }
  0x3e   : > { %v1915_v33 = vld [vmem:[%s2161_s15 + $0x80] sm:$0xff]   ;;  %1793 = vmatprep.mubr.msk.bf16.mxu0 %vm756_vm0, %v1914_v32  ;;  %v1917_v36 = vld [vmem:[%s2161_s15 + $0x88] sm:$0xff]   ;;  %v1919_v38 = vld [vmem:[%s2161_s15 + $0x90] sm:$0xff]   ;;  %s1650_s26 = sshll.u32 %s2544_s24, 3  ;;  %vm1318_vm1 = vcmask 523264  }
  0x3f   : > { %1825 = vmatprep.mubr.msk.bf16.mxu1 %vm756_vm0, %v1915_v33  ;;  %s2542_s12 = smov (!%p516_p4, %s515_s12), 2  ;;  %v1920_v39 = vld [vmem:[%s2161_s15 + $0x18] sm:$0xff]   ;;  %v1922_v41 = vld [vmem:[%s2161_s15 + $0x20] sm:$0xff]   ;;  %v1924_v43 = vld [vmem:[%s2161_s15 + $0x28] sm:$0xff]   ;;  %s2234_s6 = scalar_lea.vmem %s2518_s2, %s1650_s26 }
  0x40   : > { %s1756_s16 = sshll.u32 %s2542_s12, 3  ;;  %v1921_v40 = vld [vmem:[%s2161_s15 + $0x98] sm:$0xff]   ;;  %v1923_v42 = vld [vmem:[%s2161_s15 + $0xa0] sm:$0xff]   ;;  %v1925_v44 = vld [vmem:[%s2161_s15 + $0xa8] sm:$0xff]  }
  0x41   : > { %s520_s19 = scalar_lea.vmem %s2519_s3, %s1756_s16  ;;  %v1926_v45 = vld [vmem:[%s2161_s15 + $0x30] sm:$0xff]   ;;  %v1928_v47 = vld [vmem:[%s2161_s15 + $0x38] sm:$0xff]   ;;  %v1930_v49 = vld [vmem:[%s2161_s15 + $0x40] sm:$0xff]  }
  0x42   : > { %v1913_v34 = vld [vmem:[%s520_s19] sm:$0xff]   ;;  %v1927_v46 = vld [vmem:[%s2161_s15 + $0xb0] sm:$0xff]   ;;  %v1929_v48 = vld [vmem:[%s2161_s15 + $0xb8] sm:$0xff]  }
  0x43   : > { %1791 = vmatprep.subr.bf16.mxu0 %v1913_v34  ;;  %1857 = vmatprep.subr.bf16.mxu1 %v1913_v34  ;;  %v1931_v50 = vld [vmem:[%s2161_s15 + $0xc0] sm:$0xff]   ;;  %v1932_v51 = vld [vmem:[%s2161_s15 + $0x48] sm:$0xff]   ;;  %v1934_v53 = vld [vmem:[%s2161_s15 + $0x50] sm:$0xff]  }
  0x44   : > { %1792 = vmatpush3.bf16.msra.mxu0 %v1913_v34  ;;  %1858 = vmatpush3.bf16.msra.mxu1 %v1913_v34  ;;  %v1933_v52 = vld [vmem:[%s2161_s15 + $0xc8] sm:$0xff]   ;;  %v1935_v54 = vld [vmem:[%s2161_s15 + $0xd0] sm:$0xff]   ;;  %v1936_v55 = vld [vmem:[%s2161_s15 + $0x58] sm:$0xff]  }
  0x45   : > { %v1937_v56 = vld [vmem:[%s2161_s15 + $0xd8] sm:$0xff]   ;;  %v1938_v57 = vld [vmem:[%s2161_s15 + $0x60] sm:$0xff]   ;;  %v1940_v59 = vld [vmem:[%s2161_s15 + $0x68] sm:$0xff]  }
  0x46   : > { %v1939_v58 = vld [vmem:[%s2161_s15 + $0xe0] sm:$0xff]   ;;  %v1941_v60 = vld [vmem:[%s2161_s15 + $0xe8] sm:$0xff]   ;;  %v1942_v61 = vld [vmem:[%s2161_s15 + $0x70] sm:$0xff]  }
  0x47   : > { %1794 = vmatmul.mubr.msk.bf16.vlgmr.msra.gmra.mxu0 %vm756_vm0, %v1916_v35  ;;  %1826 = vmatmul.mubr.msk.bf16.vlgmr.msra.gmra.mxu1 %vm756_vm0, %v1917_v36  ;;  %v1943_v62 = vld [vmem:[%s2161_s15 + $0xf0] sm:$0xff]   ;;  %v1944_v63 = vld [vmem:[%s2161_s15 + $0x78] sm:$0xff]   ;;  %v1142_v4 = vld [vmem:[%s2234_s6] sm:$0xff] }
  0x48   : > { %1797 = vmatprep.mubr.msk.bf16.mxu0 %vm756_vm0, %v1918_v37  ;;  %1829 = vmatprep.mubr.msk.bf16.mxu1 %vm756_vm0, %v1919_v38  ;;  %v1945_v0 = vld [vmem:[%s2161_s15 + $0xf8] sm:$0xff]   ;;  %v1144_v1 = vld [vmem:[%s2234_s6 + $0x10] sm:$0xff]  ;;  %v1143_v14 = vld [vmem:[%s2234_s6 + $0x8] sm:$0xff] }
  0x49   : > { %v1145_v9 = vld [vmem:[%s2234_s6 + $0x18] sm:$0xff]  ;;  %v1148_v19 = vld [vmem:[%s2234_s6 + $0x30] sm:$0xff]  ;;  %v1146_v26 = vld [vmem:[%s2234_s6 + $0x20] sm:$0xff] }
  0x4a   : > { %v1149_v33 = vld [vmem:[%s2234_s6 + $0x38] sm:$0xff]  ;;  %v1147_v38 = vld [vmem:[%s2234_s6 + $0x28] sm:$0xff] }
  0x4f   : > { %1798 = vmatmul.mubr.msk.bf16.gmra.mxu0 %vm756_vm0, %v1920_v39  ;;  %1830 = vmatmul.mubr.msk.bf16.gmra.mxu1 %vm756_vm0, %v1921_v40 }
  0x50   : > { %1801 = vmatprep.mubr.msk.bf16.mxu0 %vm756_vm0, %v1922_v41  ;;  %1833 = vmatprep.mubr.msk.bf16.mxu1 %vm756_vm0, %v1923_v42 }
  0x57   : > { %1802 = vmatmul.mubr.msk.bf16.gmra.mxu0 %vm756_vm0, %v1924_v43  ;;  %1834 = vmatmul.mubr.msk.bf16.gmra.mxu1 %vm756_vm0, %v1925_v44  ;;  %v1152_v43 = vld [vmem:[%s2234_s6 + $0x50] sm:$0xff]  ;;  %v1171_v44 = vld [vmem:[%s2234_s6 + $0xe8] sm:$0xff] }
  0x58   : > { %1805 = vmatprep.mubr.msk.bf16.mxu0 %vm756_vm0, %v1926_v45  ;;  %1837 = vmatprep.mubr.msk.bf16.mxu1 %vm756_vm0, %v1927_v46 }
  0x5f   : > { %1806 = vmatmul.mubr.msk.bf16.gmra.mxu0 %vm756_vm0, %v1928_v47  ;;  %1838 = vmatmul.mubr.msk.bf16.gmra.mxu1 %vm756_vm0, %v1929_v48 }
  0x60   : > { %1809 = vmatprep.mubr.msk.bf16.mxu0 %vm756_vm0, %v1930_v49  ;;  %1841 = vmatprep.mubr.msk.bf16.mxu1 %vm756_vm0, %v1931_v50  ;;  %v1150_v50 = vld [vmem:[%s2234_s6 + $0x40] sm:$0xff] }
  0x67   : > { %1810 = vmatmul.mubr.msk.bf16.gmra.mxu0 %vm756_vm0, %v1932_v51  ;;  %1842 = vmatmul.mubr.msk.bf16.gmra.mxu1 %vm756_vm0, %v1933_v52 }
  0x68   : > { %1813 = vmatprep.mubr.msk.bf16.mxu0 %vm756_vm0, %v1934_v53  ;;  %1845 = vmatprep.mubr.msk.bf16.mxu1 %vm756_vm0, %v1935_v54 }
  0x6f   : > { %1814 = vmatmul.mubr.msk.bf16.gmra.mxu0 %vm756_vm0, %v1936_v55  ;;  %1846 = vmatmul.mubr.msk.bf16.gmra.mxu1 %vm756_vm0, %v1937_v56 }
  0x70   : > { %1817 = vmatprep.mubr.msk.bf16.mxu0 %vm756_vm0, %v1938_v57  ;;  %1849 = vmatprep.mubr.msk.bf16.mxu1 %vm756_vm0, %v1939_v58  ;;  %v1153_v57 = vld [vmem:[%s2234_s6 + $0x58] sm:$0xff] }
  0x77   : > { %1818 = vmatmul.mubr.msk.bf16.gmra.mxu0 %vm756_vm0, %v1940_v59  ;;  %1850 = vmatmul.mubr.msk.bf16.gmra.mxu1 %vm756_vm0, %v1941_v60 }
  0x78   : > { %1821 = vmatprep.mubr.msk.bf16.mxu0 %vm756_vm0, %v1942_v61  ;;  %1853 = vmatprep.mubr.msk.bf16.mxu1 %vm756_vm0, %v1943_v62  ;;  %v1151_v62 = vld [vmem:[%s2234_s6 + $0x48] sm:$0xff] }
  0x7f   : > { %1822 = vmatmul.mubr.msk.bf16.gmra.mxu0 %vm756_vm0, %v1944_v63  ;;  %1854 = vmatmul.mubr.msk.bf16.gmra.mxu1 %vm756_vm0, %v1945_v0 }
 0x107   : > { %v1795_v2 = vpop.f32.mrf.mxu0  ;;  %v1827_v3 = vpop.f32.mrf.mxu1 }
 0x108   : > { %v2238_v5 = vadd.f32 %v1795_v2, %v1144_v1  ;;  %v2240_v6 = vadd.f32 %v1827_v3, %v1144_v1  ;;  %v1156_v3 = vld [vmem:[%s2234_s6 + $0x70] sm:$0xff] }
 0x109   : > { %v887_v7 = vpop.f32.mrf.mxu0  ;;  %v1015_v8 = vpop.f32.mrf.mxu1 }
 0x10a   : > { %v2243_v10 = vadd.f32 %v1142_v4, %v887_v7  ;;  %v2245_v11 = vadd.f32 %v1142_v4, %v1015_v8 }
 0x10b   : > { %v1796_v12 = vpop.f32.mrf.mxu0  ;;  %v1828_v13 = vpop.f32.mrf.mxu1 }
 0x10c   : > { %v2248_v15 = vadd.f32 %v1796_v12, %v1145_v9  ;;  %v2250_v16 = vadd.f32 %v1828_v13, %v1145_v9 }
 0x10d   : > { %v890_v17 = vpop.f32.mrf.mxu0  ;;  %v1018_v18 = vpop.f32.mrf.mxu1 }
 0x10e   : > { %v1239_v20 = vpack.c.bf16 %v2248_v15, %v2238_v5  ;;  %v1255_v21 = vpack.c.bf16 %v2250_v16, %v2240_v6  ;;  %v2257_v22 = vadd.f32 %v1143_v14, %v890_v17  ;;  %v2259_v23 = vadd.f32 %v1143_v14, %v1018_v18  ;;  %v1154_v14 = vld [vmem:[%s2234_s6 + $0x60] sm:$0xff]  ;;  %v1164_v18 = vld [vmem:[%s2234_s6 + $0xb0] sm:$0xff] }
 0x10f   : > { %v1799_v24 = vpop.f32.mrf.mxu0  ;;  %v1831_v25 = vpop.f32.mrf.mxu1 }
 0x110   : > { %v2266_v29 = vadd.f32 %v1799_v24, %v1148_v19  ;;  %v2268_v30 = vadd.f32 %v1831_v25, %v1148_v19  ;;  %v2523_v5 = vpack.c.bf16 %v2257_v22, %v2243_v10 }
 0x111   : > { %v903_v31 = vpop.f32.mrf.mxu0  ;;  %v1031_v32 = vpop.f32.mrf.mxu1 }
 0x112   : > { %v2271_v34 = vadd.f32 %v1146_v26, %v903_v31  ;;  %v2273_v35 = vadd.f32 %v1146_v26, %v1031_v32  ;;  %v1157_v31 = vld [vmem:[%s2234_s6 + $0x78] sm:$0xff] }
 0x113   : > { %v1800_v36 = vpop.f32.mrf.mxu0  ;;  %v1832_v37 = vpop.f32.mrf.mxu1 }
 0x114   : > { %v2276_v39 = vadd.f32 %v1800_v36, %v1149_v33  ;;  %v2278_v40 = vadd.f32 %v1832_v37, %v1149_v33 }
 0x115   : > { %v906_v41 = vpop.f32.mrf.mxu0  ;;  %v1034_v42 = vpop.f32.mrf.mxu1 }
 0x116   : > { %v2285_v46 = vadd.f32 %v1147_v38, %v906_v41  ;;  %v2287_v47 = vadd.f32 %v1147_v38, %v1034_v42  ;;  %v1155_v38 = vld [vmem:[%s2234_s6 + $0x68] sm:$0xff] }
 0x117   : > { %v1803_v48 = vpop.f32.mrf.mxu0  ;;  %v1835_v49 = vpop.f32.mrf.mxu1 }
 0x118   : > { %v2294_v53 = vadd.f32 %v1803_v48, %v1152_v43  ;;  %v2296_v54 = vadd.f32 %v1835_v49, %v1152_v43 }
 0x119   : > { %v919_v55 = vpop.f32.mrf.mxu0  ;;  %v1047_v56 = vpop.f32.mrf.mxu1 }
 0x11a   : > { %v2299_v58 = vadd.f32 %v1150_v50, %v919_v55  ;;  %v2301_v59 = vadd.f32 %v1150_v50, %v1047_v56 }
 0x11b   : > { %v1804_v60 = vpop.f32.mrf.mxu0  ;;  %v1836_v61 = vpop.f32.mrf.mxu1 }
 0x11c   : > { %v2304_v63 = vadd.f32 %v1804_v60, %v1153_v57  ;;  %v2306_v0 = vadd.f32 %v1836_v61, %v1153_v57 }
 0x11d   : > { %v922_v1 = vpop.f32.mrf.mxu0  ;;  %v1050_v2 = vpop.f32.mrf.mxu1 }
 0x11e   : > { %v2313_v8 = vadd.f32 %v1151_v62, %v922_v1  ;;  %v2315_v9 = vadd.f32 %v1151_v62, %v1050_v2  ;;  %v1160_v1 = vld [vmem:[%s2234_s6 + $0x90] sm:$0xff] }
 0x11f   : > { %v1807_v12 = vpop.f32.mrf.mxu0  ;;  %v1839_v13 = vpop.f32.mrf.mxu1 }
 0x120   : > { %v2322_v19 = vadd.f32 %v1807_v12, %v1156_v3  ;;  %v2324_v24 = vadd.f32 %v1839_v13, %v1156_v3  ;;  %v1161_v12 = vld [vmem:[%s2234_s6 + $0x98] sm:$0xff] }
 0x121   : > { %v935_v25 = vpop.f32.mrf.mxu0  ;;  %v1063_v26 = vpop.f32.mrf.mxu1 }
 0x122   : > { %v2327_v32 = vadd.f32 %v1154_v14, %v935_v25  ;;  %v2329_v33 = vadd.f32 %v1154_v14, %v1063_v26 }
 0x123   : > { %v1808_v36 = vpop.f32.mrf.mxu0  ;;  %v1840_v37 = vpop.f32.mrf.mxu1 }
 0x124   : > { %v2332_v41 = vadd.f32 %v1808_v36, %v1157_v31  ;;  %v2334_v42 = vadd.f32 %v1840_v37, %v1157_v31  ;;  %v1159_v37 = vld [vmem:[%s2234_s6 + $0x88] sm:$0xff] }
 0x125   : > { %v938_v43 = vpop.f32.mrf.mxu0  ;;  %v1066_v48 = vpop.f32.mrf.mxu1 }
 0x126   : > { %v2340_v55 = vadd.f32 %v1155_v38, %v938_v43  ;;  %v2342_v56 = vadd.f32 %v1155_v38, %v1066_v48  ;;  %v1158_v48 = vld [vmem:[%s2234_s6 + $0x80] sm:$0xff] }
 0x127   : > { %v1811_v57 = vpop.f32.mrf.mxu0  ;;  %v1843_v60 = vpop.f32.mrf.mxu1 }
 0x128   : > { %v1224_v13 = vadd.f32 %v1843_v60, %v1160_v1  ;;  %v1192_v26 = vadd.f32 %v1811_v57, %v1160_v1 }
 0x129   : > { %v951_v2 = vpop.f32.mrf.mxu0  ;;  %v1079_v3 = vpop.f32.mrf.mxu1 }
 0x12a   : > { %v1190_v60 = vadd.f32 %v1158_v48, %v951_v2 }
 0x12b   : > { %v1812_v14 = vpop.f32.mrf.mxu0  ;;  %v1844_v25 = vpop.f32.mrf.mxu1 }
 0x12c   : > { %v1193_v31 = vadd.f32 %v1812_v14, %v1161_v12  ;;  %v1225_v36 = vadd.f32 %v1844_v25, %v1161_v12  ;;  %v1165_v12 = vld [vmem:[%s2234_s6 + $0xb8] sm:$0xff] }
 0x12d   : > { %v954_v38 = vpop.f32.mrf.mxu0  ;;  %v1082_v43 = vpop.f32.mrf.mxu1 }
 0x12e   : > { %v1263_v50 = vpack.c.bf16 %v1225_v36, %v1224_v13  ;;  %v1247_v49 = vpack.c.bf16 %v1193_v31, %v1192_v26  ;;  %v1191_v61 = vadd.f32 %v1159_v37, %v954_v38  ;;  %v1223_v25 = vadd.f32 %v1159_v37, %v1082_v43  ;;  %v1163_v36 = vld [vmem:[%s2234_s6 + $0xa8] sm:$0xff]  ;;  %v1162_v43 = vld [vmem:[%s2234_s6 + $0xa0] sm:$0xff] }
 0x12f   : > { %v1815_v62 = vpop.f32.mrf.mxu0  ;;  %v1847_v7 = vpop.f32.mrf.mxu1  ;;  %v1222_v38 = vadd.f32 %v1158_v48, %v1079_v3 }
 0x130   : > { %1304 = vrot.lane.b32.xlu1 %v1263_v50, %s1997_s7  ;;  %1288 = vrot.lane.b32.xlu0 %v1247_v49, %s1997_s7  ;;  %v1246_v14 = vpack.c.bf16 %v1191_v61, %v1190_v60  ;;  %v1196_v26 = vadd.f32 %v1815_v62, %v1164_v18  ;;  %v1228_v2 = vadd.f32 %v1847_v7, %v1164_v18  ;;  %v1166_v60 = vld [vmem:[%s2234_s6 + $0xc0] sm:$0xff] }
 0x131   : > { %v967_v57 = vpop.f32.mrf.mxu0  ;;  %v1095_v1 = vpop.f32.mrf.mxu1  ;;  %v1262_v52 = vpack.c.bf16 %v1223_v25, %v1222_v38 }
 0x133   : > { %v1816_v4 = vpop.f32.mrf.mxu0  ;;  %v1848_v13 = vpop.f32.mrf.mxu1 }
 0x134   : > { %v1197_v31 = vadd.f32 %v1816_v4, %v1165_v12  ;;  %1286 = vrot.lane.b32.xlu0 %v1246_v14, %s1997_s7  ;;  %v1229_v49 = vadd.f32 %v1848_v13, %v1165_v12  ;;  %v1226_v4 = vadd.f32 %v1162_v43, %v1095_v1  ;;  %v1169_v14 = vld [vmem:[%s2234_s6 + $0xd8] sm:$0xff]  ;;  %v1167_v13 = vld [vmem:[%s2234_s6 + $0xc8] sm:$0xff] }
 0x135   : > { %v970_v17 = vpop.f32.mrf.mxu0  ;;  %v1098_v50 = vpop.f32.mrf.mxu1 }
 0x136   : > { %v1249_v51 = vpack.c.bf16 %v1197_v31, %v1196_v26  ;;  %v1227_v45 = vadd.f32 %v1163_v36, %v1098_v50  ;;  %v1265_v48 = vpack.c.bf16 %v1229_v49, %v1228_v2  ;;  %v1195_v7 = vadd.f32 %v1163_v36, %v970_v17  ;;  %v1168_v31 = vld [vmem:[%s2234_s6 + $0xd0] sm:$0xff] }
 0x137   : > { %v1819_v61 = vpop.f32.mrf.mxu0  ;;  %v1851_v37 = vpop.f32.mrf.mxu1  ;;  %v1194_v26 = vadd.f32 %v1162_v43, %v967_v57 }
 0x138   : > { %1292 = vrot.lane.b32.xlu1 %v1249_v51, %s1997_s7  ;;  %1302 = vrot.lane.b32.xlu0 %v1262_v52, %s1997_s7  ;;  %v1264_v18 = vpack.c.bf16 %v1227_v45, %v1226_v4  ;;  %v1200_v36 = vadd.f32 %v1819_v61, %v1168_v31  ;;  %v1172_v61 = vld [vmem:[%s2234_s6 + $0xf0] sm:$0xff] }
 0x139   : > { %v983_v62 = vpop.f32.mrf.mxu0  ;;  %v1111_v3 = vpop.f32.mrf.mxu1  ;;  %v1248_v38 = vpack.c.bf16 %v1195_v7, %v1194_v26  ;;  %v1173_v26 = vld [vmem:[%s2234_s6 + $0xf8] sm:$0xff] }
 0x13a   : > { %v1198_v52 = vadd.f32 %v1166_v60, %v983_v62  ;;  %v1230_v49 = vadd.f32 %v1166_v60, %v1111_v3  ;;  %v1170_v62 = vld [vmem:[%s2234_s6 + $0xe0] sm:$0xff] }
 0x13b   : > { %v1820_v12 = vpop.f32.mrf.mxu0  ;;  %v1852_v25 = vpop.f32.mrf.mxu1 }
 0x13c   : > { %1308 = vrot.lane.b32.xlu1 %v1265_v48, %s1997_s7  ;;  %1306 = vrot.lane.b32.xlu0 %v1264_v18, %s1997_s7  ;;  %v1201_v50 = vadd.f32 %v1820_v12, %v1169_v14  ;;  %v1232_v18 = vadd.f32 %v1851_v37, %v1168_v31  ;;  %v1233_v7 = vadd.f32 %v1852_v25, %v1169_v14 }
 0x13d   : > { %v986_v51 = vpop.f32.mrf.mxu0  ;;  %v1114_v1 = vpop.f32.mrf.mxu1 }
 0x13e   : > { %v1199_v2 = vadd.f32 %v1167_v13, %v986_v51  ;;  %v1231_v57 = vadd.f32 %v1167_v13, %v1114_v1  ;;  %v1251_v28 = vpack.c.bf16 %v1201_v50, %v1200_v36  ;;  %v1267_v13 = vpack.c.bf16 %v1233_v7, %v1232_v18 }
 0x13f   : > { %v1823_v45 = vpop.f32.mrf.mxu0  ;;  %v1855_v17 = vpop.f32.mrf.mxu1  ;;  %v2524_v7 = vpack.c.bf16 %v2276_v39, %v2266_v29  ;;  %v2526_v39 = vpack.c.bf16 %v2278_v40, %v2268_v30  ;;  %v2528_v30 = vpack.c.bf16 %v2285_v46, %v2271_v34  ;;  %v2530_v34 = vpack.c.bf16 %v2304_v63, %v2294_v53 }
 0x140   : > { %v1250_v4 = vpack.c.bf16 %v1199_v2, %v1198_v52  ;;  %1290 = vrot.lane.b32.xlu1 %v1248_v38, %s1997_s7  ;;  %v1266_v27 = vpack.c.bf16 %v1231_v57, %v1230_v49  ;;  %v1204_v37 = vadd.f32 %v1823_v45, %v1172_v61  ;;  %v1236_v50 = vadd.f32 %v1855_v17, %v1172_v61 }
 0x141   : > { %v999_v43 = vpop.f32.mrf.mxu0  ;;  %v1127_v48 = vpop.f32.mrf.mxu1  ;;  %v2532_v63 = vpack.c.bf16 %v2306_v0, %v2296_v54  ;;  %v2534_v0 = vpack.c.bf16 %v2332_v41, %v2322_v19  ;;  %v2536_v41 = vpack.c.bf16 %v2334_v42, %v2324_v24 }
 0x142   : > { %1294 = vrot.lane.b32.xlu0 %v1250_v4, %s1997_s7  ;;  %v1202_v1 = vadd.f32 %v1170_v62, %v999_v43  ;;  %v1234_v14 = vadd.f32 %v1170_v62, %v1127_v48 }
 0x143   : > { %v1824_v12 = vpop.f32.mrf.mxu0  ;;  %v1856_v51 = vpop.f32.mrf.mxu1 }
 0x144   : > { %1296 = vrot.lane.b32.xlu1 %v1251_v28, %s1997_s7  ;;  %v1205_v38 = vadd.f32 %v1824_v12, %v1173_v26  ;;  %v1237_v36 = vadd.f32 %v1856_v51, %v1173_v26  ;;  %v2525_v12 = vpack.c.bf16 %v2259_v23, %v2245_v11  ;;  %v2527_v23 = vpack.c.bf16 %v2287_v47, %v2273_v35 }
 0x145   : > { %v1002_v3 = vpop.f32.mrf.mxu0  ;;  %v1130_v60 = vpop.f32.mrf.mxu1 }
 0x146   : > { %v1203_v52 = vadd.f32 %v1171_v44, %v1002_v3  ;;  %1310 = vrot.lane.b32.xlu0 %v1266_v27, %s1997_s7  ;;  %v1235_v31 = vadd.f32 %v1171_v44, %v1130_v60  ;;  %v1253_v2 = vpack.c.bf16 %v1205_v38, %v1204_v37  ;;  %v1269_v49 = vpack.c.bf16 %v1237_v36, %v1236_v50 }
 0x148   : > { %v1252_v25 = vpack.c.bf16 %v1203_v52, %v1202_v1  ;;  %1312 = vrot.lane.b32.xlu1 %v1267_v13, %s1997_s7  ;;  %v1268_v28 = vpack.c.bf16 %v1235_v31, %v1234_v14 }
 0x14a   : > { %1298 = vrot.lane.b32.xlu0 %v1252_v25, %s1997_s7  ;;  %v2529_v25 = vpack.c.bf16 %v2313_v8, %v2299_v58  ;;  %v2531_v8 = vpack.c.bf16 %v2315_v9, %v2301_v59  ;;  %v2533_v9 = vpack.c.bf16 %v2340_v55, %v2327_v32 }
 0x14c   : > { %1300 = vrot.lane.b32.xlu1 %v1253_v2, %s1997_s7 }
 0x14e   : > { %1314 = vrot.lane.b32.xlu0 %v1268_v28, %s1997_s7 }
 0x150   : > { %1316 = vrot.lane.b32.xlu1 %v1269_v49, %s1997_s7 }
 0x1a2   : > { %v1305_v27 = vpop.permute.xlu1 %1304  ;;  %v1289_v45 = vpop.permute.xlu0 %1288 }
 0x1a3   : > { %v1348_v44 = vsel %vm1318_vm1, %v1255_v21, %v1305_v27  ;;  %v1324_v57 = vsel %vm1318_vm1, %v1239_v20, %v1289_v45 }
 0x1a4   : > { %v1736_v17 = vcombine.low %v1348_v44, %v1348_v44  ;;  %v1737_v4 = vcombine.high %v1348_v44, %v1348_v44  ;;  %v1720_v43 = vcombine.low %v1324_v57, %v1324_v57  ;;  %v1721_v48 = vcombine.high %v1324_v57, %v1324_v57 }
 0x1a6   : > { %1497 = vst [vmem:[%s2389_s9 + $0x48] sm:$0xf] %v1736_v17  ;;  %1498 = vst [vmem:[%s2389_s9 + $0x4c] sm:$0xf] %v1737_v4  ;;  %v1287_v6 = vpop.permute.xlu0 %1286 }
 0x1a7   : > { %1481 = vst [vmem:[%s2389_s9 + $0x8] sm:$0xf] %v1720_v43  ;;  %1482 = vst [vmem:[%s2389_s9 + $0xc] sm:$0xf] %v1721_v48  ;;  %v1321_v15 = vsel %vm1318_vm1, %v2523_v5, %v1287_v6 }
 0x1a8   : > { %v1718_v16 = vcombine.low %v1321_v15, %v1321_v15  ;;  %v1719_v20 = vcombine.high %v1321_v15, %v1321_v15 }
 0x1aa   : > { %v1293_v21 = vpop.permute.xlu1 %1292  ;;  %1479 = vst [vmem:[%s2389_s9] sm:$0xf] %v1718_v16  ;;  %1480 = vst [vmem:[%s2389_s9 + $0x4] sm:$0xf] %v1719_v20  ;;  %v1303_v18 = vpop.permute.xlu0 %1302  ;;  %v2535_v16 = vpack.c.bf16 %v2342_v56, %v2329_v33 }
 0x1ab   : > { %v1330_v62 = vsel %vm1318_vm1, %v2524_v7, %v1293_v21  ;;  %v1345_v10 = vsel %vm1318_vm1, %v2525_v12, %v1303_v18 }
 0x1ac   : > { %v1724_v22 = vcombine.low %v1330_v62, %v1330_v62  ;;  %v1725_v26 = vcombine.high %v1330_v62, %v1330_v62  ;;  %v1734_v51 = vcombine.low %v1345_v10, %v1345_v10  ;;  %v1735_v61 = vcombine.high %v1345_v10, %v1345_v10 }
 0x1ae   : > { %1485 = vst [vmem:[%s2389_s9 + $0x18] sm:$0xf] %v1724_v22  ;;  %1486 = vst [vmem:[%s2389_s9 + $0x1c] sm:$0xf] %v1725_v26  ;;  %v1309_v3 = vpop.permute.xlu1 %1308  ;;  %v1307_v29 = vpop.permute.xlu0 %1306 }
 0x1af   : > { %1495 = vst [vmem:[%s2389_s9 + $0x40] sm:$0xf] %v1734_v51  ;;  %1496 = vst [vmem:[%s2389_s9 + $0x44] sm:$0xf] %v1735_v61  ;;  %v1354_v11 = vsel %vm1318_vm1, %v2526_v39, %v1309_v3  ;;  %v1351_v60 = vsel %vm1318_vm1, %v2527_v23, %v1307_v29 }
 0x1b0   : > { %v1740_v13 = vcombine.low %v1354_v11, %v1354_v11  ;;  %v1741_v1 = vcombine.high %v1354_v11, %v1354_v11  ;;  %v1738_v38 = vcombine.low %v1351_v60, %v1351_v60  ;;  %v1739_v52 = vcombine.high %v1351_v60, %v1351_v60 }
 0x1b2   : > { %1501 = vst [vmem:[%s2389_s9 + $0x58] sm:$0xf] %v1740_v13  ;;  %1502 = vst [vmem:[%s2389_s9 + $0x5c] sm:$0xf] %v1741_v1  ;;  %v1291_v37 = vpop.permute.xlu1 %1290 }
 0x1b3   : > { %1499 = vst [vmem:[%s2389_s9 + $0x50] sm:$0xf] %v1738_v38  ;;  %1500 = vst [vmem:[%s2389_s9 + $0x54] sm:$0xf] %v1739_v52  ;;  %v1327_v35 = vsel %vm1318_vm1, %v2528_v30, %v1291_v37 }
 0x1b4   : > { %v1722_v40 = vcombine.low %v1327_v35, %v1327_v35  ;;  %v1723_v47 = vcombine.high %v1327_v35, %v1327_v35  ;;  %v1295_v14 = vpop.permute.xlu0 %1294 }
 0x1b5   : > { %v1333_v31 = vsel %vm1318_vm1, %v2529_v25, %v1295_v14 }
 0x1b6   : > { %1483 = vst [vmem:[%s2389_s9 + $0x10] sm:$0xf] %v1722_v40  ;;  %1484 = vst [vmem:[%s2389_s9 + $0x14] sm:$0xf] %v1723_v47  ;;  %v1726_v50 = vcombine.low %v1333_v31, %v1333_v31  ;;  %v1727_v2 = vcombine.high %v1333_v31, %v1333_v31  ;;  %v1297_v36 = vpop.permute.xlu1 %1296 }
 0x1b7   : > { %v1336_v46 = vsel %vm1318_vm1, %v2530_v34, %v1297_v36 }
 0x1b8   : > { %1487 = vst [vmem:[%s2389_s9 + $0x20] sm:$0xf] %v1726_v50  ;;  %1488 = vst [vmem:[%s2389_s9 + $0x24] sm:$0xf] %v1727_v2  ;;  %v1728_v28 = vcombine.low %v1336_v46, %v1336_v46  ;;  %v1729_v49 = vcombine.high %v1336_v46, %v1336_v46  ;;  %v1311_v58 = vpop.permute.xlu0 %1310 }
 0x1b9   : > { %v1357_v27 = vsel %vm1318_vm1, %v2531_v8, %v1311_v58 }
 0x1ba   : > { %1489 = vst [vmem:[%s2389_s9 + $0x28] sm:$0xf] %v1728_v28  ;;  %1490 = vst [vmem:[%s2389_s9 + $0x2c] sm:$0xf] %v1729_v49  ;;  %v1742_v44 = vcombine.low %v1357_v27, %v1357_v27  ;;  %v1743_v45 = vcombine.high %v1357_v27, %v1357_v27  ;;  %v1313_v53 = vpop.permute.xlu1 %1312 }
 0x1bb   : > { %v1360_v17 = vsel %vm1318_vm1, %v2532_v63, %v1313_v53 }
 0x1bc   : > { %1503 = vst [vmem:[%s2389_s9 + $0x60] sm:$0xf] %v1742_v44  ;;  %1504 = vst [vmem:[%s2389_s9 + $0x64] sm:$0xf] %v1743_v45  ;;  %v1744_v4 = vcombine.low %v1360_v17, %v1360_v17  ;;  %v1745_v57 = vcombine.high %v1360_v17, %v1360_v17  ;;  %v1299_v59 = vpop.permute.xlu0 %1298 }
 0x1bd   : > { %v1339_v43 = vsel %vm1318_vm1, %v2533_v9, %v1299_v59 }
 0x1be   : > { %1505 = vst [vmem:[%s2389_s9 + $0x68] sm:$0xf] %v1744_v4  ;;  %1506 = vst [vmem:[%s2389_s9 + $0x6c] sm:$0xf] %v1745_v57  ;;  %v1730_v48 = vcombine.low %v1339_v43, %v1339_v43  ;;  %v1731_v6 = vcombine.high %v1339_v43, %v1339_v43  ;;  %v1301_v54 = vpop.permute.xlu1 %1300 }
 0x1bf   : > { %v1342_v5 = vsel %vm1318_vm1, %v2534_v0, %v1301_v54 }
 0x1c0   : > { %1491 = vst [vmem:[%s2389_s9 + $0x30] sm:$0xf] %v1730_v48  ;;  %1492 = vst [vmem:[%s2389_s9 + $0x34] sm:$0xf] %v1731_v6  ;;  %v1732_v15 = vcombine.low %v1342_v5, %v1342_v5  ;;  %v1733_v32 = vcombine.high %v1342_v5, %v1342_v5  ;;  %v1315_v55 = vpop.permute.xlu0 %1314 }
 0x1c1   : > { %v1363_v20 = vsel %vm1318_vm1, %v2535_v16, %v1315_v55 }
 0x1c2   : > { %1493 = vst [vmem:[%s2389_s9 + $0x38] sm:$0xf] %v1732_v15  ;;  %1494 = vst [vmem:[%s2389_s9 + $0x3c] sm:$0xf] %v1733_v32  ;;  %v1746_v21 = vcombine.low %v1363_v20, %v1363_v20  ;;  %v1747_v18 = vcombine.high %v1363_v20, %v1363_v20  ;;  %v1317_v19 = vpop.permute.xlu1 %1316 }
 0x1c3   : > { %v1366_v7 = vsel %vm1318_vm1, %v2536_v41, %v1317_v19 }
 0x1c4   : > { %1507 = vst [vmem:[%s2389_s9 + $0x70] sm:$0xf] %v1746_v21  ;;  %1508 = vst [vmem:[%s2389_s9 + $0x74] sm:$0xf] %v1747_v18  ;;  %v1748_v62 = vcombine.low %v1366_v7, %v1366_v7  ;;  %v1749_v12 = vcombine.high %v1366_v7, %v1366_v7 }
 0x1c6   : > { %1509 = vst [vmem:[%s2389_s9 + $0x78] sm:$0xf] %v1748_v62  ;;  %1510 = vst [vmem:[%s2389_s9 + $0x7c] sm:$0xf] %v1749_v12 }
 0x1c7   : > { %s1757_s11 = sshll.u32 %s2054_s23, 10  ;;  %s1535_s12 = sshll.u32 %s2389_s9, 4  ;;  %s1536_s12 = int_to_ptr.vmem [resolvable:$true] %s1535_s12 }
 0x1c8   : > { %s1524_s16 = scalar_lea.hbm %s2520_s4, %s1757_s11  ;;  %s1998_s17 = smov 1024  }
 0x1c9   : > { %1859 = sst [smem:[#allocation8]] (%p2072_p11), %s1998_s17  ;;  %s1999_s13 = smov 3072  }
 0x1ca   : > { %1860 = sst [smem:[#allocation8 + $0x1]] (%p2072_p11), %s1999_s13  ;;  %s2000_s18 = smov 16  }
 0x1cb   : > { %1861 = sst [smem:[#allocation8 + $0x2]] (%p2072_p11), %s2000_s18  ;;  %s2001_s19 = smov 64  }
 0x1cc   : > { %1862 = sst [smem:[#allocation8 + $0x3]] (%p2072_p11), %s2001_s19  ;;  %s2002_s23 = smov 4  }
 0x1cd   : > { %1863 = sst [smem:[#allocation8 + $0x4]] (%p2072_p11), %s2001_s19  ;;  %s2003_s24 = smov 131072  }
 0x1ce   : > { %1864 = sst [smem:[#allocation8 + $0x5]] (%p2072_p11), %s2002_s23  ;;  %s2004_s26 = smov 0  }
 0x1cf   : > { %1865 = dma.general (%p2072_p11), %s1536_s12, 2048, %s1524_s16, %s1512_s10, %s2003_s24, [#allocation8], %s2004_s26, 0  }
 0x1d0 PF: > { %p1871_p6 = scmp.ge.s32.totalorder %s1994_s22, 2  ;;  %s1563_s27 = sand.u32 1, %s1982_s20  }
 0x1d1   : > { %s1564_s5 = scalar_lea.sflag [#allocation6], %s1563_s27 }
 0x1d2   : > { %p1868_p7 = pnand %p1871_p6, %p2076_p13 }
 0x1d4   : > { %p1869_p8 = pneg %p1868_p7 }
 0x1d6   : > { %1977 = dma.done.wait (%p1869_p8), %s1564_s5, 2048  }
 0x1d7   : > { %1979 = vsyncadd (%p1869_p8), %s1564_s5, 4294965248  ;;  %p20_p9 = scmp.ge.s32.totalorder %s2058_s25, 5   ;;  %s2537_s20 = smov %s1986_s21 }
 0x1d8   : > { %s2538_s21 = smov %s1990_s0  ;;  %s2539_s0 = smov %s2070_s28 }
 0x1d9   : > { %s2540_s22 = smov %s2058_s25  ;;  %22 = sbr.rel (!%p20_p9) target bundleno = 18 (0x12), region = 124 }
 0x1de   :  { %1569 = vsyncpa [#allocation6], 1 }
 0x1df   :  { %1571 = vsyncpa [#allocation6 + $0x1], 1 }

</bundles_post_ra>
